<compile_context>
chip_gen: v7x
topology: tpu7x:2x2x1
jax: 0.10.0
libtpu: 0.0.40
codegen_flags: <defaults>
</compile_context>

<pallas_src>
import jax
import jax.numpy as jnp
from jax import lax
from jax.experimental import pallas as pl
from jax.experimental.pallas import tpu as pltpu

D_IN = 2
D_OUT = 2


def linear_permute_kernel(x_ref, w_ref, b_ref, o_ref):
    # x_ref: (1, TILE_S, D_IN)   input rows for this (batch, seq-tile)
    # w_ref: (D_OUT, D_IN)       full weight (tiny; block index is constant so
    #                            the pipeline does not re-DMA it per step)
    # b_ref: (D_OUT, 1)          bias as a column -> broadcasts over lanes
    # o_ref: (1, D_OUT, TILE_S)  transposed output slab, lane-dense in S
    x = x_ref[0]          # (TILE_S, D_IN)
    w = w_ref[...]        # (D_OUT, D_IN)
    # y^T = W @ x^T : contract the feature axis of both operands directly
    # (same "trans_b" dimension numbers as q @ k^T in flash attention), so no
    # separate transpose op is materialized.
    yt = lax.dot_general(
        w, x,
        dimension_numbers=(((1,), (1,)), ((), ())),
        preferred_element_type=jnp.float32,
    )                      # (D_OUT, TILE_S)
    o_ref[0] = (yt + b_ref[...]).astype(o_ref.dtype)


def _pick_tile_s(S):
    # Prefer a lane-dense tile (multiple of 128) that divides S; for small S
    # fall back to the full sequence length (block == full dim is always legal).
    for t in (512, 256, 128):
        if S % t == 0:
            return t
    return S


def pallas_linear_permute(x, weight, bias):
    """x: (B, S, D_IN) -> (B, D_OUT, S)  ==  (x @ W.T + b).permute(0, 2, 1)."""
    B, S, Din = x.shape
    Dout, Din_w = weight.shape
    assert Din == Din_w
    tile_s = _pick_tile_s(S)
    grid = (B, S // tile_s)
    bias2d = bias.reshape(Dout, 1)

    return pl.pallas_call(
        linear_permute_kernel,
        out_shape=jax.ShapeDtypeStruct((B, Dout, S), x.dtype),
        grid_spec=pltpu.PrefetchScalarGridSpec(
            num_scalar_prefetch=0,
            grid=grid,
            in_specs=[
                pl.BlockSpec((1, tile_s, Din), lambda b, s: (b, s, 0)),
                pl.BlockSpec((Dout, Din), lambda b, s: (0, 0)),
                pl.BlockSpec((Dout, 1), lambda b, s: (0, 0)),
            ],
            out_specs=pl.BlockSpec((1, Dout, tile_s), lambda b, s: (b, 0, s)),
        ),
        compiler_params=pltpu.CompilerParams(
            # Both axes are independent -> eligible for megacore sharding (v7x).
            dimension_semantics=("parallel", "parallel"),
        ),
    )(x, weight, bias2d)


def reference(x, weight, bias):
    y = jnp.einsum("bsi,oi->bso", x, weight) + bias
    return jnp.transpose(y, (0, 2, 1))


if __name__ == "__main__":
    key = jax.random.PRNGKey(0)
    kx, kw, kb = jax.random.split(key, 3)

    # Small shapes consistent with Linear(2, 2): last dim must be 2.
    B, S = 2, 8
    x = jax.random.normal(kx, (B, S, D_IN), dtype=jnp.float32)

    # Deterministic parameter init (uniform like PyTorch's default 1/sqrt(fan_in)).
    bound = 1.0 / jnp.sqrt(jnp.float32(D_IN))
    weight = jax.random.uniform(kw, (D_OUT, D_IN), minval=-bound, maxval=bound,
                                dtype=jnp.float32)
    bias = jax.random.uniform(kb, (D_OUT,), minval=-bound, maxval=bound,
                              dtype=jnp.float32)

    out = pallas_linear_permute(x, weight, bias)
    out = jax.block_until_ready(out)

    ref = reference(x, weight, bias)
    assert out.shape == (B, D_OUT, S), out.shape
    assert jnp.allclose(out, ref, atol=1e-5, rtol=1e-5), "mismatch vs reference"

    print("KERNEL_OK")
</pallas_src>

<mosaic_0001>
module attributes {stable_mosaic.version = 11 : i64} {
  func.func @linear_permute_kernel(%arg0: i32, %arg1: i32, %arg2: memref<1x8x2xf32, #tpu.memory_space<vmem>>, %arg3: memref<2x2xf32, #tpu.memory_space<vmem>>, %arg4: memref<2x1xf32, #tpu.memory_space<vmem>>, %arg5: memref<1x2x8xf32, #tpu.memory_space<vmem>>) attributes {dimension_semantics = [#tpu.dimension_semantics<parallel>, #tpu.dimension_semantics<parallel>], iteration_bounds = array<i64: 2, 1>, scalar_prefetch = 0 : i64, scratch_operands = 0 : i64, tpu.core_type = #tpu.core_type<tc>, window_params = [{transform_indices = @transform_0, window_bounds = array<i64: 1, 8, 2>}, {pipeline_mode = #tpu.pipeline_mode<synchronous>, transform_indices = @transform_1, window_bounds = array<i64: 2, 2>}, {pipeline_mode = #tpu.pipeline_mode<synchronous>, transform_indices = @transform_2, window_bounds = array<i64: 2, 1>}, {transform_indices = @transform_3, window_bounds = array<i64: 1, 2, 8>}]} {
    %c0 = arith.constant 0 : index
    %c0_0 = arith.constant 0 : index
    %c0_1 = arith.constant 0 : index
    %0 = vector.load %arg2[%c0, %c0_0, %c0_1] : memref<1x8x2xf32, #tpu.memory_space<vmem>>, vector<1x8x2xf32>
    %1 = vector.shape_cast %0 : vector<1x8x2xf32> to vector<8x2xf32>
    %c0_2 = arith.constant 0 : index
    %c0_3 = arith.constant 0 : index
    %2 = vector.load %arg3[%c0_2, %c0_3] : memref<2x2xf32, #tpu.memory_space<vmem>>, vector<2x2xf32>
    %cst = arith.constant dense<0.000000e+00> : vector<2x8xf32>
    %3 = tpu.matmul %2, %1, %cst {dimension_numbers = #tpu.dot_dimension_numbers<[1], [1], [0], [0], [0, 0, 1, 0], [], []>} : vector<2x2xf32>, vector<8x2xf32>, vector<2x8xf32> -> vector<2x8xf32>
    %c0_4 = arith.constant 0 : index
    %c0_5 = arith.constant 0 : index
    %4 = vector.load %arg4[%c0_4, %c0_5] : memref<2x1xf32, #tpu.memory_space<vmem>>, vector<2x1xf32>
    %5 = vector.broadcast %4 : vector<2x1xf32> to vector<2x8xf32>
    %6 = arith.addf %3, %5 : vector<2x8xf32>
    %c0_6 = arith.constant 0 : index
    %c0_7 = arith.constant 0 : index
    %c0_8 = arith.constant 0 : index
    %7 = vector.load %arg5[%c0_6, %c0_7, %c0_8] : memref<1x2x8xf32, #tpu.memory_space<vmem>>, vector<1x2x8xf32>
    %8 = vector.shape_cast %7 : vector<1x2x8xf32> to vector<2x8xf32>
    %9 = vector.shape_cast %6 : vector<2x8xf32> to vector<1x2x8xf32>
    tpu.vector_store %arg5[%c0_6, %c0_7, %c0_8], %9 {strides = array<i32>} : memref<1x2x8xf32, #tpu.memory_space<vmem>>, vector<1x2x8xf32>,
    return
  }
  func.func @transform_0(%arg0: i32, %arg1: i32) -> (i32, i32, i32) {
    %c0_i32 = arith.constant 0 : i32
    %c0_i32_0 = arith.constant 0 : i32
    return %arg0, %arg1, %c0_i32 : i32, i32, i32
  }
  func.func @transform_1(%arg0: i32, %arg1: i32) -> (i32, i32) {
    %c0_i32 = arith.constant 0 : i32
    %c0_i32_0 = arith.constant 0 : i32
    %c0_i32_1 = arith.constant 0 : i32
    return %c0_i32, %c0_i32_0 : i32, i32
  }
  func.func @transform_2(%arg0: i32, %arg1: i32) -> (i32, i32) {
    %c0_i32 = arith.constant 0 : i32
    %c0_i32_0 = arith.constant 0 : i32
    %c0_i32_1 = arith.constant 0 : i32
    return %c0_i32, %c0_i32_0 : i32, i32
  }
  func.func @transform_3(%arg0: i32, %arg1: i32) -> (i32, i32, i32) {
    %c0_i32 = arith.constant 0 : i32
    %c0_i32_0 = arith.constant 0 : i32
    return %arg0, %c0_i32, %arg1 : i32, i32, i32
  }
}

</mosaic_0001>

<bundles_post_ra>
// kernel: tpu_custom_call.1
= control target key start
LH: loop header
LB: loop body
LE: loop exit
PB: predicated region body
PF: predicated region fallthrough
CT: control target
= control target key end

     0   :  { %8 = vsyncpa [#allocation3], 0  ;;  %s665_s0 = inlined_call_operand.vmem [shape: f32[2,8,2], index: 0, kind: input, shape index: {}]   ;;  %s666_s1 = inlined_call_operand.vmem [shape: f32[2,2], index: 1, kind: input, shape index: {}]   ;;  %s667_s2 = inlined_call_operand.vmem [shape: f32[2,1], index: 2, kind: input, shape index: {}]   ;;  %s668_s3 = inlined_call_operand.hbm [shape: f32[2,2,8], index: 3, kind: output, shape index: {}]  }
   0x1   :  { %10 = vsyncpa [#allocation3 + $0x1], 0  ;;  %s547_s12 = smov 0   ;;  %s549_s13 = smov 0  }
   0x2   :  { %s551_s14 = smov 0   ;;  %s553_s15 = smov 0  }
   0x3   :  { %s555_s16 = smov 0   ;;  %s557_s17 = smov 0  }
   0x4 LB: > { %s364_s18 = sadd.s32 4294967295, %s521_s17   ;;  %s365_s19 = sadd.s32 4294967294, %s521_s17   ;;  %s521_s17 = sphi %s557_s17, %s16_s17   ;;  %s517_s16 = sphi %s555_s16, %s675_s16   ;;  %s513_s15 = sphi %s553_s15, %s674_s15   ;;  %s509_s14 = sphi %s551_s14, %s673_s14   ;;  %s505_s13 = sphi %s549_s13, %s672_s13   ;;  %s501_s12 = sphi %s547_s12, %s671_s12  }
   0x5   : > { %s28_s20 = sadd.s32 1, %s517_s16  ;;  %s107_s21 = sadd.s32 1, %s509_s14 }
   0x6   : > { %p30_p0 = scmp.ge.s32.totalorder %s28_s20, 2  ;;  %p117_p1 = scmp.ne.s32.totalorder %s509_s14, %s505_s13 }
   0x7   : > { %p118_p2 = scmp.eq.s32.totalorder %s364_s18, 1  ;;  %p123_p3 = scmp.ne.s32.totalorder %s505_s13, %s501_s12 }
   0x8   : > { %s677_s20 = smov (%p30_p0, %s28_s20), 0  ;;  %p124_p5 = scmp.eq.s32.totalorder %s365_s19, 1 }
   0x9   : > { %p587_p4 = por %p118_p2, %p117_p1  ;;  %s102_s23 = ssub.s32 %s517_s16, %s677_s20 }
   0xa   : > { %p368_p6 = scmp.ge.s32.totalorder %s521_s17, 1  ;;  %p105_p7 = scmp.eq.s32.totalorder %s102_s23, 0 }
   0xb   : > { %p594_p8 = por %p124_p5, %p123_p3  ;;  %p158_p9 = scmp.lt.s32.totalorder %s521_s17, 3 }
   0xc   : > { %s600_s25 = scalar_select %p105_p7, %s509_s14, %s107_s21  }
   0xd   : > { %p159_p10 = pnand %p368_p6, %p158_p9 }
   0xe   : > { %p184_p11 = scmp.lt.s32.totalorder (!%p159_p10), %s513_s15, 1  ;;  %v523_v0 = vmov (!%p159_p10), 0.0   ;;  %vm524_vm0 = vmmov (!%p159_p10), 0   ;;  %v193_v1 = vld [vmem:[%s667_s2] sm:$0x3] (!%p159_p10)  ;;  %v525_v2 = vmov (!%p159_p10), 0  }
   0xf   : > { %162 = sbr.rel (%p159_p10) target bundleno = 258 (0x102), region = 32  ;;  %379 = vmatprep.subr.mxu0 (!%p159_p10), %v523_v0  ;;  %381 = vmatprep.mubr.msk.f32.mxu0 (!%p159_p10), %vm524_vm0, %v523_v0  ;;  %vm199_vm1 = vcmask (!%p159_p10), 15360   ;;  %v192_v4 = vld [vmem:[%s666_s1] sm:$0x3] (!%p159_p10)  ;;  %s181_s8 = sand.u32 (!%p159_p10), 1, %s505_s13   ;;  %vm276_vm2 = vcmask (!%p159_p10), 58368  }
  0x10   : > { %442 = vset.pattern.permute.xlu0 (!%p159_p10), %v525_v2  ;;  %s369_s9 = sshll.u32 (!%p159_p10), %s181_s8, 1  ;;  %s374_s10 = sshll.u32 (!%p159_p10), %s513_s15, 5 }
  0x11   : > { %196 = vperm.xlu0 (!%p159_p10), %442, %v193_v1   ;;  %s183_s11 = scalar_lea.vmem (!%p159_p10), [#allocation2], %s369_s9  ;;  %s618_s23 = scalar_lea.hbm (!%p159_p10), %s668_s3, %s374_s10 }
  0x12   : > { %s293_s18 = sshll.u32 (!%p159_p10), %s183_s11, 4  ;;  %s279_s26 = scalar_lea.sflag (!%p159_p10), [#allocation3], %s181_s8  ;;  %s620_s18 = int_to_ptr.vmem [resolvable:$true] %s293_s18 }
  0x13   : > { %s443_s27 = scalar_lea.vmem (!%p159_p10), %s620_s18, 32 }
  0x14   : > { %p444_p12 = scmp.ne.s32.totalorder (!%p159_p10), %s620_s18, %s443_s27 }
  0x16   : > { %s185_s28 = scalar_select %p184_p11, %s513_s15, 1 }
  0x17   : > { %p445_p13 = pnand %p444_p12, %p587_p4  ;;  %s526_s15 = smov [#allocation2]  }
  0x18   : > { %s370_s29 = sshll.u32 %s185_s28, 3  ;;  %s447_s28 = sshll.u32 %s526_s15, 4  ;;  %s448_s28 = int_to_ptr.vmem [resolvable:$false] %s447_s28 }
  0x19   : > { %s190_s5 = scalar_lea.vmem %s665_s0, %s370_s29  ;;  %p446_p0 = pneg %p445_p13 }
  0x1a   : > { %v191_v3 = vld [vmem:[%s190_s5] sm:$0xff]  ;;  %s449_s29 = scalar_lea.vmem %s448_s28, 64  ;;  %p450_p1 = scmp.lt.s32.totalorder %s620_s18, %s448_s28 }
  0x1b   : > { %380 = vmatpush3.xpose.msk.msra.mxu0 %vm199_vm1, %v191_v3  ;;  %p451_p2 = scmp.lt.s32.totalorder %s449_s29, %s443_s27 }
  0x1d   : > { %p452_p3 = por %p451_p2, %p450_p1 }
  0x1e   : > { %382 = vmatmul.mubr.msk.f32.vlgmr.msra.gmra.mrb[0].mxu0 %vm199_vm1, %v192_v4 }
  0x1f   : > { %p453_p5 = pnand %p452_p3, %p446_p0 }
  0x90   : > { %v197_v5 = vpop.permute.xlu0 %196 }
  0xf1   : > { %v272_v6 = vpop.f32.mrb[0].mxu0 }
  0xf2   : > { %v273_v7 = vadd.f32 %v272_v6, %v197_v5  ;;  %v383_v8 = vpop.f32.mrb[1].mxu0 }
  0xf4   : > { %277 = vst.msk [vmem:[%s183_s11] sm:$0x3] %vm276_vm2, %v273_v7 }
  0xf5   : > { %456 = shalt.err (!%p453_p5)
}
  0xf6   : > { %s457_s30 = scalar_lea.hbm %s618_s23, 32  ;;  %s461_s6 = scalar_lea.hbm %s668_s3, 64 }
  0xf7   : > { %p458_p6 = scmp.ne.s32.totalorder %s618_s23, %s457_s30  ;;  %p462_p10 = scmp.lt.u32.totalorder %s618_s23, %s668_s3 }
  0xf8   : > { %p463_p11 = scmp.lt.u32.totalorder %s461_s6, %s457_s30  ;;  %p465_p13 = scmp.lt.u32.totalorder %s457_s30, %s618_s23 }
  0xf9   : > { %p459_p7 = pnand %p458_p6, %p587_p4 }
  0xfa   : > { %p464_p12 = por %p463_p11, %p462_p10 }
  0xfb   : > { %p460_p9 = pneg %p459_p7 }
  0xfc   : > { %p466_p0 = por %p465_p13, %p464_p12 }
  0xfe   : > { %p467_p1 = pnand %p466_p0, %p460_p9 }
 0x100   : > { %470 = shalt.err (!%p467_p1)
}
 0x101   : > { %384 = dma.vmem_to_hbm [thread:$0]  (%p587_p4), %s620_s18, 32, %s618_s23, %s279_s26  }
 0x102 PF: > { %p390_p2 = scmp.ge.s32.totalorder %s521_s17, 2  ;;  %s305_s9 = sand.u32 1, %s501_s12  }
 0x103   : > { %s306_s10 = scalar_lea.sflag [#allocation3], %s305_s9 }
 0x104   : > { %p387_p3 = pnand %p390_p2, %p594_p8 }
 0x106   : > { %496 = dma.done.wait (!%p387_p3), %s306_s10, 32  }
 0x107   : > { %498 = vsyncadd (!%p387_p3), %s306_s10, 4294967264  ;;  %s16_s17 = sadd.s32 1, %s521_s17   ;;  %s671_s12 = smov %s505_s13 }
 0x108   : > { %p13_p5 = scmp.ge.s32.totalorder %s16_s17, 4   ;;  %s672_s13 = smov %s509_s14 }
 0x109   : > { %s673_s14 = smov %s600_s25  ;;  %s674_s15 = smov %s517_s16 }
 0x10a   : > { %s675_s16 = smov %s677_s20  ;;  %15 = sbr.rel (!%p13_p5) target bundleno = 4 (0x4), region = 67 }
 0x111   :  { %311 = vsyncpa [#allocation3], 1 }
 0x112   :  { %313 = vsyncpa [#allocation3 + $0x1], 1 }

</bundles_post_ra>
